<compile_context>
chip_gen: v6e
topology: v6e:2x2x1
jax: 0.10.0
libtpu: 0.0.40
codegen_flags: <defaults>
</compile_context>

<pallas_src>
import jax
import jax.numpy as jnp
from jax.experimental import pallas as pl
from jax.experimental.pallas import tpu as pltpu


def _round_up(x, m):
    return ((x + m - 1) // m) * m


def _head_kernel(x_ref, w1_ref, b1_ref, w2_ref, b2_ref, o_ref):
    x = x_ref[...]  # [TB, H], native dtype (no upcast)

    # dense: y = x @ W1^T + b1   (W1 kept in PyTorch [out, in] layout; contract
    # the last dim of both operands -> no transpose copy, f32 accumulation).
    h = jax.lax.dot_general(
        x, w1_ref[...],
        dimension_numbers=(((1,), (1,)), ((), ())),
        preferred_element_type=jnp.float32,
    ) + b1_ref[...].astype(jnp.float32)

    # tanh + bias in f32 (v5e has no bf16 VPU/EUP; EUP slot is free anyway).
    h = jnp.tanh(h)

    # out_proj: [TB, H] x [L_pad, H]^T -> [TB, L_pad]  (L_pad = 128, lane-dense)
    out = jax.lax.dot_general(
        h.astype(x.dtype), w2_ref[...],
        dimension_numbers=(((1,), (1,)), ((), ())),
        preferred_element_type=jnp.float32,
    ) + b2_ref[...].astype(jnp.float32)

    o_ref[...] = out.astype(o_ref.dtype)


def wav2vec2_classification_head(features, dense_w, dense_b, out_w, out_b,
                                 *, block_b=256):
    """features: [B, H]; dense_w: [H, H] (PyTorch [out,in]); dense_b: [H];
    out_w: [L, H] (PyTorch [out,in]); out_b: [L].  Returns [B, L]."""
    B, H = features.shape
    L = out_w.shape[0]

    # Lane-dense label dim: pad L up to a multiple of 128 (min 128).
    L_pad = _round_up(max(L, 128), 128)

    # Batch tile: multiple of 8 sublanes; cap at block_b for VMEM headroom
    # (v7x has 64 MiB VMEM / ~32 MiB scoped default — keep tiles modest).
    TB = block_b if B >= block_b else _round_up(B, 8)
    B_pad = _round_up(B, TB)

    x = features
    if B_pad != B:
        x = jnp.pad(x, ((0, B_pad - B), (0, 0)))

    # Pad out_proj weight/bias along the label (out) dim with zeros; keep
    # [out, in] layout. Biases become 2-D rows for clean VMEM layout.
    w2p = jnp.pad(out_w, ((0, L_pad - L), (0, 0)))
    b2p = jnp.pad(out_b, ((0, L_pad - L),)).reshape(1, L_pad)
    b1r = dense_b.reshape(1, H)

    grid = (B_pad // TB,)

    out = pl.pallas_call(
        _head_kernel,
        out_shape=jax.ShapeDtypeStruct((B_pad, L_pad), features.dtype),
        grid=grid,
        in_specs=[
            pl.BlockSpec((TB, H), lambda i: (i, 0)),       # x tile (pipelined)
            pl.BlockSpec((H, H), lambda i: (0, 0)),        # W1, VMEM-resident
            pl.BlockSpec((1, H), lambda i: (0, 0)),        # b1
            pl.BlockSpec((L_pad, H), lambda i: (0, 0)),    # W2 (padded out dim)
            pl.BlockSpec((1, L_pad), lambda i: (0, 0)),    # b2 (padded)
        ],
        out_specs=pl.BlockSpec((TB, L_pad), lambda i: (i, 0)),
        compiler_params=pltpu.CompilerParams(
            dimension_semantics=("parallel",),
        ),
    )(x, dense_w, b1r, w2p, b2p)

    return out[:B, :L]


def _reference(features, dense_w, dense_b, out_w, out_b):
    h = jnp.tanh(features @ dense_w.T + dense_b)
    return h @ out_w.T + out_b


if __name__ == "__main__":
    # config: hidden_size=32, num_labels=4, final_dropout unused at inference.
    B, H, L = 2, 32, 4

    key = jax.random.PRNGKey(0)
    k_x, k_w1, k_b1, k_w2, k_b2 = jax.random.split(key, 5)

    features = jax.random.normal(k_x, (B, H), dtype=jnp.float32)
    dense_w = jax.random.normal(k_w1, (H, H), dtype=jnp.float32) * 0.1
    dense_b = jax.random.normal(k_b1, (H,), dtype=jnp.float32) * 0.1
    out_w = jax.random.normal(k_w2, (L, H), dtype=jnp.float32) * 0.1
    out_b = jax.random.normal(k_b2, (L,), dtype=jnp.float32) * 0.1

    out = wav2vec2_classification_head(features, dense_w, dense_b, out_w, out_b)
    out = jax.block_until_ready(out)

    ref = _reference(features, dense_w, dense_b, out_w, out_b)
    assert out.shape == (B, L)
    assert jnp.allclose(out, ref, atol=1e-5, rtol=1e-5)

    print("KERNEL_OK")
</pallas_src>

<mosaic_0001>
module attributes {stable_mosaic.version = 11 : i64} {
  func.func @_head_kernel(%arg0: i32, %arg1: memref<8x32xf32, #tpu.memory_space<vmem>>, %arg2: memref<32x32xf32, #tpu.memory_space<vmem>>, %arg3: memref<1x32xf32, #tpu.memory_space<vmem>>, %arg4: memref<128x32xf32, #tpu.memory_space<vmem>>, %arg5: memref<1x128xf32, #tpu.memory_space<vmem>>, %arg6: memref<8x128xf32, #tpu.memory_space<vmem>>) attributes {dimension_semantics = [#tpu.dimension_semantics<parallel>], iteration_bounds = array<i64: 1>, scalar_prefetch = 0 : i64, scratch_operands = 0 : i64, tpu.core_type = #tpu.core_type<tc>, window_params = [{transform_indices = @transform_0, window_bounds = array<i64: 8, 32>}, {pipeline_mode = #tpu.pipeline_mode<synchronous>, transform_indices = @transform_1, window_bounds = array<i64: 32, 32>}, {pipeline_mode = #tpu.pipeline_mode<synchronous>, transform_indices = @transform_2, window_bounds = array<i64: 1, 32>}, {pipeline_mode = #tpu.pipeline_mode<synchronous>, transform_indices = @transform_3, window_bounds = array<i64: 128, 32>}, {pipeline_mode = #tpu.pipeline_mode<synchronous>, transform_indices = @transform_4, window_bounds = array<i64: 1, 128>}, {transform_indices = @transform_5, window_bounds = array<i64: 8, 128>}]} {
    %c0 = arith.constant 0 : index
    %c0_0 = arith.constant 0 : index
    %0 = vector.load %arg1[%c0, %c0_0] : memref<8x32xf32, #tpu.memory_space<vmem>>, vector<8x32xf32>
    %c0_1 = arith.constant 0 : index
    %c0_2 = arith.constant 0 : index
    %1 = vector.load %arg2[%c0_1, %c0_2] : memref<32x32xf32, #tpu.memory_space<vmem>>, vector<32x32xf32>
    %cst = arith.constant dense<0.000000e+00> : vector<8x32xf32>
    %2 = tpu.matmul %0, %1, %cst {dimension_numbers = #tpu.dot_dimension_numbers<[1], [1], [0], [0], [0, 0, 1, 0], [], []>} : vector<8x32xf32>, vector<32x32xf32>, vector<8x32xf32> -> vector<8x32xf32>
    %c0_3 = arith.constant 0 : index
    %c0_4 = arith.constant 0 : index
    %3 = vector.load %arg3[%c0_3, %c0_4] : memref<1x32xf32, #tpu.memory_space<vmem>>, vector<1x32xf32>
    %4 = vector.broadcast %3 : vector<1x32xf32> to vector<8x32xf32>
    %5 = arith.addf %2, %4 : vector<8x32xf32>
    %6 = math.tanh %5 : vector<8x32xf32>
    %c0_5 = arith.constant 0 : index
    %c0_6 = arith.constant 0 : index
    %7 = vector.load %arg4[%c0_5, %c0_6] : memref<128x32xf32, #tpu.memory_space<vmem>>, vector<128x32xf32>
    %cst_7 = arith.constant dense<0.000000e+00> : vector<8x128xf32>
    %8 = tpu.matmul %6, %7, %cst_7 {dimension_numbers = #tpu.dot_dimension_numbers<[1], [1], [0], [0], [0, 0, 1, 0], [], []>} : vector<8x32xf32>, vector<128x32xf32>, vector<8x128xf32> -> vector<8x128xf32>
    %c0_8 = arith.constant 0 : index
    %c0_9 = arith.constant 0 : index
    %9 = vector.load %arg5[%c0_8, %c0_9] : memref<1x128xf32, #tpu.memory_space<vmem>>, vector<1x128xf32>
    %10 = vector.broadcast %9 : vector<1x128xf32> to vector<8x128xf32>
    %11 = arith.addf %8, %10 : vector<8x128xf32>
    %c0_10 = arith.constant 0 : index
    %c0_11 = arith.constant 0 : index
    %12 = vector.load %arg6[%c0_10, %c0_11] : memref<8x128xf32, #tpu.memory_space<vmem>>, vector<8x128xf32>
    tpu.vector_store %arg6[%c0_10, %c0_11], %11 {strides = array<i32>} : memref<8x128xf32, #tpu.memory_space<vmem>>, vector<8x128xf32>,
    return
  }
  func.func @transform_0(%arg0: i32) -> (i32, i32) {
    %c0_i32 = arith.constant 0 : i32
    %c0_i32_0 = arith.constant 0 : i32
    return %arg0, %c0_i32 : i32, i32
  }
  func.func @transform_1(%arg0: i32) -> (i32, i32) {
    %c0_i32 = arith.constant 0 : i32
    %c0_i32_0 = arith.constant 0 : i32
    %c0_i32_1 = arith.constant 0 : i32
    return %c0_i32, %c0_i32_0 : i32, i32
  }
  func.func @transform_2(%arg0: i32) -> (i32, i32) {
    %c0_i32 = arith.constant 0 : i32
    %c0_i32_0 = arith.constant 0 : i32
    %c0_i32_1 = arith.constant 0 : i32
    return %c0_i32, %c0_i32_0 : i32, i32
  }
  func.func @transform_3(%arg0: i32) -> (i32, i32) {
    %c0_i32 = arith.constant 0 : i32
    %c0_i32_0 = arith.constant 0 : i32
    %c0_i32_1 = arith.constant 0 : i32
    return %c0_i32, %c0_i32_0 : i32, i32
  }
  func.func @transform_4(%arg0: i32) -> (i32, i32) {
    %c0_i32 = arith.constant 0 : i32
    %c0_i32_0 = arith.constant 0 : i32
    %c0_i32_1 = arith.constant 0 : i32
    return %c0_i32, %c0_i32_0 : i32, i32
  }
  func.func @transform_5(%arg0: i32) -> (i32, i32) {
    %c0_i32 = arith.constant 0 : i32
    %c0_i32_0 = arith.constant 0 : i32
    return %arg0, %c0_i32 : i32, i32
  }
}

</mosaic_0001>

<bundles_post_ra>
// kernel: tpu_custom_call.1
= control target key start
LH: loop header
LB: loop body
LE: loop exit
PB: predicated region body
PF: predicated region fallthrough
CT: control target
= control target key end

     0   :  { %vm33_vm0 = vcmask 261120   ;;  %v398_v1 = vmov 0.0   ;;  %vm399_vm1 = vmmov 0   ;;  %s547_s0 = inlined_call_operand.vmem [shape: f32[8,32], index: 0, kind: input, shape index: {}]   ;;  %s548_s1 = inlined_call_operand.vmem [shape: f32[32,32], index: 1, kind: input, shape index: {}]   ;;  %s549_s2 = inlined_call_operand.vmem [shape: f32[1,32], index: 2, kind: input, shape index: {}]   ;;  %s550_s3 = inlined_call_operand.vmem [shape: f32[128,32], index: 3, kind: input, shape index: {}]   ;;  %s551_s4 = inlined_call_operand.vmem [shape: f32[1,128], index: 4, kind: input, shape index: {}]   ;;  %s552_s5 = inlined_call_operand.hbm [shape: f32[8,128], index: 5, kind: output, shape index: {}]  }
   0x1   :  { %v25_v0 = vld [vmem:[%s548_s1 + $0x18] sm:$0xff]  ;;  %325 = vmatprep.subr.mxu0 %v398_v1  ;;  %333 = vmatprep.mubr.msk.f32.mxu0 %vm399_vm1, %v398_v1  ;;  %v24_v3 = vld [vmem:[%s548_s1 + $0x10] sm:$0xff] }
   0x2   :  { %v135_v2 = vld [vmem:[%s550_s3 + $0x78] sm:$0xff]  ;;  %326 = vmatpush3.xpose.msk.msra.mxu0 %vm33_vm0, %v25_v0  ;;  %336 = vmatprep.subr.mxu1 %v398_v1  ;;  %v134_v4 = vld [vmem:[%s550_s3 + $0x70] sm:$0xff] }
   0x3   :  { %327 = vmatprep.subr.mxu0 %v398_v1  ;;  %337 = vmatpush3.xpose.msk.msra.mxu1 %vm33_vm0, %v135_v2 }
   0x4   :  { %338 = vmatprep.subr.mxu1 %v398_v1  ;;  %368 = vmatprep.mubr.msk.f32.mxu1 %vm399_vm1, %v398_v1 }
   0x6   :  { %328 = vmatpush3.xpose.msk.msra.mxu0 %vm33_vm0, %v24_v3 }
   0x7   :  { %10 = vsyncpa [#allocation3], 0  ;;  %329 = vmatprep.subr.mxu0 %v398_v1  ;;  %v23_v5 = vld [vmem:[%s548_s1 + $0x8] sm:$0xff]  ;;  %339 = vmatpush3.xpose.msk.msra.mxu1 %vm33_vm0, %v134_v4  ;;  %v22_v7 = vld [vmem:[%s548_s1] sm:$0xff]  ;;  %s400_s1 = smov [#allocation2]  }
   0x8   :  { %340 = vmatprep.subr.mxu1 %v398_v1  ;;  %v133_v6 = vld [vmem:[%s550_s3 + $0x68] sm:$0xff]  ;;  %v132_v8 = vld [vmem:[%s550_s3 + $0x60] sm:$0xff]  ;;  %v131_v10 = vld [vmem:[%s550_s3 + $0x58] sm:$0xff]  ;;  %s271_s12 = sshll.u32 %s400_s1, 4  ;;  %s272_s12 = int_to_ptr.vmem [resolvable:$true] %s271_s12 }
   0x9   :  { %v21_v9 = vld [vmem:[%s547_s0] sm:$0xff]  ;;  %v130_v11 = vld [vmem:[%s550_s3 + $0x50] sm:$0xff]  ;;  %v129_v12 = vld [vmem:[%s550_s3 + $0x48] sm:$0xff]  ;;  %p381_p1 = scmp.lt.s32.totalorder %s272_s12, %s272_s12 }
   0xa   :  { %330 = vmatpush3.xpose.msk.msra.mxu0 %vm33_vm0, %v23_v5  ;;  %v128_v13 = vld [vmem:[%s550_s3 + $0x40] sm:$0xff]  ;;  %v127_v14 = vld [vmem:[%s550_s3 + $0x38] sm:$0xff]  ;;  %v126_v15 = vld [vmem:[%s550_s3 + $0x30] sm:$0xff] }
   0xb   :  { %331 = vmatprep.subr.mxu0 %v398_v1  ;;  %341 = vmatpush3.xpose.msk.msra.mxu1 %vm33_vm0, %v133_v6  ;;  %v125_v16 = vld [vmem:[%s550_s3 + $0x28] sm:$0xff]  ;;  %v124_v17 = vld [vmem:[%s550_s3 + $0x20] sm:$0xff]  ;;  %v123_v18 = vld [vmem:[%s550_s3 + $0x18] sm:$0xff] }
   0xc   :  { %342 = vmatprep.subr.mxu1 %v398_v1  ;;  %v122_v19 = vld [vmem:[%s550_s3 + $0x10] sm:$0xff]  ;;  %v121_v20 = vld [vmem:[%s550_s3 + $0x8] sm:$0xff]  ;;  %v120_v21 = vld [vmem:[%s550_s3] sm:$0xff]  ;;  %s376_s3 = scalar_lea.vmem %s272_s12, 128 }
   0xd   :  { %v279_v22 = vld [vmem:[%s549_s2] ss:$0 sm:$0xff]  ;;  %p377_p0 = scmp.ne.s32.totalorder %s272_s12, %s376_s3  ;;  %p382_p2 = scmp.lt.s32.totalorder %s376_s3, %s376_s3 }
   0xe   :  { %332 = vmatpush3.xpose.msk.msra.mxu0 %vm33_vm0, %v22_v7  ;;  %v285_v27 = vld [vmem:[%s551_s4] ss:$0 sm:$0xff] }
   0xf   :  { %343 = vmatpush3.xpose.msk.msra.mxu1 %vm33_vm0, %v132_v8  ;;  %p383_p3 = por %p382_p2, %p381_p1 }
  0x10   :  { %344 = vmatprep.subr.mxu1 %v398_v1 }
  0x11   :  { %334 = vmatmul.mubr.msk.f32.vlgmr.msra.gmra.mxu0 %vm33_vm0, %v21_v9  ;;  %p384_p4 = pnand %p383_p3, %p377_p0 }
  0x13   :  { %345 = vmatpush3.xpose.msk.msra.mxu1 %vm33_vm0, %v131_v10 }
  0x14   :  { %346 = vmatprep.subr.mxu1 %v398_v1 }
  0x17   :  { %347 = vmatpush3.xpose.msk.msra.mxu1 %vm33_vm0, %v130_v11 }
  0x18   :  { %348 = vmatprep.subr.mxu1 %v398_v1 }
  0x1b   :  { %349 = vmatpush3.xpose.msk.msra.mxu1 %vm33_vm0, %v129_v12 }
  0x1c   :  { %350 = vmatprep.subr.mxu1 %v398_v1 }
  0x1f   :  { %351 = vmatpush3.xpose.msk.msra.mxu1 %vm33_vm0, %v128_v13 }
  0x20   :  { %352 = vmatprep.subr.mxu1 %v398_v1 }
  0x23   :  { %353 = vmatpush3.xpose.msk.msra.mxu1 %vm33_vm0, %v127_v14 }
  0x24   :  { %354 = vmatprep.subr.mxu1 %v398_v1 }
  0x27   :  { %355 = vmatpush3.xpose.msk.msra.mxu1 %vm33_vm0, %v126_v15 }
  0x28   :  { %356 = vmatprep.subr.mxu1 %v398_v1 }
  0x2b   :  { %357 = vmatpush3.xpose.msk.msra.mxu1 %vm33_vm0, %v125_v16 }
  0x2c   :  { %358 = vmatprep.subr.mxu1 %v398_v1 }
  0x2f   :  { %359 = vmatpush3.xpose.msk.msra.mxu1 %vm33_vm0, %v124_v17 }
  0x30   :  { %360 = vmatprep.subr.mxu1 %v398_v1 }
  0x33   :  { %361 = vmatpush3.xpose.msk.msra.mxu1 %vm33_vm0, %v123_v18 }
  0x34   :  { %362 = vmatprep.subr.mxu1 %v398_v1 }
  0x37   :  { %363 = vmatpush3.xpose.msk.msra.mxu1 %vm33_vm0, %v122_v19 }
  0x38   :  { %364 = vmatprep.subr.mxu1 %v398_v1 }
  0x3b   :  { %365 = vmatpush3.xpose.msk.msra.mxu1 %vm33_vm0, %v121_v20 }
  0x3c   :  { %366 = vmatprep.subr.mxu1 %v398_v1 }
  0x3f   :  { %367 = vmatpush3.xpose.msk.msra.mxu1 %vm33_vm0, %v120_v21 }
  0xd1   :  { %v115_v23 = vpop.f32.mrf.mxu0 }
  0xd2   :  { %v116_v24 = vadd.f32 %v279_v22, %v115_v23 }
  0xd3   :  { %v335_v25 = vpop.f32.mrf.mxu0 }
  0xd4   :  { %374 = vtanh.f32 %v116_v24 }
  0xe1   :  { %v375_v26 = vpop.eup %374 }
  0xe2   :  { %369 = vmatmul.mubr.msk.f32.vlgmr.msra.gmra.mxu1 %vm33_vm0, %v375_v26 }
 0x1a2   :  { %v260_v28 = vpop.f32.mrf.mxu1 }
 0x1a3   :  { %v261_v29 = vadd.f32 %v285_v27, %v260_v28 }
 0x1a4   :  { %v370_v30 = vpop.f32.mrf.mxu1 }
 0x1a5   :  { %264 = vst [vmem:[#allocation2] sm:$0xff] %v261_v29 }
 0x1a6   :  { %387 = shalt.err (!%p384_p4)
}
 0x1a7   :  { %274 = dma.vmem_to_hbm [thread:$0]  %s272_s12, 128, %s552_s5, [#allocation3]  }
 0x1a8   :  { %396 = dma.done.wait [#allocation3], 128  }
 0x1a9   :  { %397 = vsyncadd [#allocation3], 4294967168 }
 0x1aa   :  { %278 = vsyncpa [#allocation3], 1 }

</bundles_post_ra>
